<compile_context>
chip_gen: v7x
topology: tpu7x:2x2x1
jax: 0.10.0
libtpu: 0.0.40
codegen_flags: <defaults>
</compile_context>

<pallas_src>
import functools

import jax
import jax.numpy as jnp
from jax.experimental import pallas as pl
from jax.experimental.pallas import tpu as pltpu

K = 128
BOT_DIM = K // 8          # 16
LATENT = K // BOT_DIM     # 8

_SELU_ALPHA = 1.6732632423543772
_SELU_SCALE = 1.0507009873554805


def _selu(x):
    # Clamp exp argument so the unselected positive branch never produces inf.
    return _SELU_SCALE * jnp.where(
        x > 0, x, _SELU_ALPHA * (jnp.exp(jnp.minimum(x, 0.0)) - 1.0))


def _vae_kernel(x_ref, eps_ref, w_e0, w_mid, w_e3, w_d3, b_all,
                recon_ref, mulv_ref, *, f_out):
    f32 = jnp.float32

    def linear(v, w, b):
        # MXU operands in the weights' dtype (bf16 on v6e/v7x), f32 accumulate.
        y = jnp.dot(v.astype(w.dtype), w, preferred_element_type=f32)
        return y + b

    x = x_ref[...].astype(f32)

    # ---- encoder (hidden widths zero-padded to 128 lanes; padding inert) ----
    h = _selu(linear(x, w_e0[...], b_all[0:1, :K]))
    h = _selu(linear(h, w_mid[0], b_all[1:2, :K]))
    h = _selu(linear(h, w_mid[1], b_all[2:3, :K]))
    mulv = linear(h, w_e3[...], b_all[3:4, :2 * K])      # [tile_b, 256]
    mu = mulv[:, :K]        # lanes 0..127  (real mu in lanes 0..LATENT-1)
    logvar = mulv[:, K:]    # lanes 128..255 (vreg-boundary split: free)

    # ---- reparameterize: z = mu + eps * exp(0.5*logvar) (f32 elementwise) ----
    # Padded lanes: mu=0, logvar=0, eps=0 -> z=0; decoder weight rows there
    # are zero anyway, so padding cannot leak into real outputs.
    z = mu + eps_ref[...].astype(f32) * jnp.exp(0.5 * logvar)

    # ---- decoder ----
    d = _selu(linear(z, w_mid[2], b_all[4:5, :K]))
    d = _selu(linear(d, w_mid[3], b_all[5:6, :K]))
    d = _selu(linear(d, w_mid[4], b_all[6:7, :K]))
    recon = linear(d, w_d3[...], b_all[7:8, :f_out])     # [tile_b, F_out]

    # Both outputs are lane-dense (multiples of 128) -> unmasked vst.
    recon_ref[...] = recon.astype(recon_ref.dtype)
    mulv_ref[...] = mulv.astype(mulv_ref.dtype)


def init_vae_params(key, feature_dim, dtype=jnp.float32):
    """Deterministic init mirroring the PyTorch layer shapes.

    Weights are stored as [in_dim, out_dim] (transposed w.r.t. nn.Linear),
    biases as [1, out_dim].
    """
    dims = [
        ("en_fc0", feature_dim, K),
        ("en_fc1", K, K // 2),
        ("en_fc2", K // 2, K // 4),
        ("en_fc31", K // 4, LATENT),
        ("en_fc32", K // 4, LATENT),
        ("de_fc0", LATENT, K // 4),
        ("de_fc1", K // 4, K // 2),
        ("de_fc2", K // 2, K),
        ("de_fc3", K, feature_dim),
    ]
    params = {}
    for name, fan_in, fan_out in dims:
        key, kw, kb = jax.random.split(key, 3)
        bound = 1.0 / jnp.sqrt(fan_in)
        w = jax.random.uniform(kw, (fan_in, fan_out), dtype, -bound, bound)
        b = jax.random.uniform(kb, (1, fan_out), dtype, -bound, bound)
        params[name] = (w, b)
    return params


def _cdiv(a, b):
    return -(-a // b)


def _round_up(x, m):
    return (x + m - 1) // m * m


def _pad2(w, rows, cols):
    r, c = w.shape
    return jnp.pad(w, ((0, rows - r), (0, cols - c)))


@functools.partial(jax.jit, static_argnames=("tile_b", "compute_dtype"))
def vae_forward(x, eps, params, tile_b=None, compute_dtype=jnp.float32):
    """x: [..., feature_dim]; eps: [B, LATENT] standard-normal noise.

    Returns (recon [B, feature_dim], mu [B, LATENT], logvar [B, LATENT]).
    recon dtype follows x (pass bf16 x for a bf16 I/O path); mu/logvar are f32.
    """
    feature_dim = x.shape[-1]
    x2 = x.reshape(-1, feature_dim)          # x.view(-1, feature_dim)
    B = x2.shape[0]
    F_out = _round_up(feature_dim, 128)      # lane-dense recon width
    BW = max(2 * K, F_out)                   # packed-bias row width

    # ---- batch tiling: minimal padding, ~512-row tiles; even grid (>1 step)
    # keeps v7x's two TensorCores balanced; a single tile on v5e/v6e avoids
    # pointless sequential grid steps. ----
    if tile_b is None:
        n_steps = max(1, _cdiv(B, 512))
        if n_steps > 1 and n_steps % 2:
            n_steps += 1
        tile_b = _round_up(_cdiv(B, n_steps), 8)
    B_pad = _round_up(max(B, tile_b), tile_b)
    grid = (B_pad // tile_b,)

    if B_pad != B:
        x2 = jnp.pad(x2, ((0, B_pad - B), (0, 0)))
    # eps zero-padded to 128 lanes (lane-dense load; padded lanes inert).
    eps_p = jnp.pad(eps.astype(jnp.float32),
                    ((0, B_pad - B), (0, K - LATENT)))

    # ---- pad / fuse params to lane-dense widths; pack mid weights & biases ----
    cd = compute_dtype
    w_e0, b_e0 = params["en_fc0"]
    w_e1, b_e1 = params["en_fc1"]
    w_e2, b_e2 = params["en_fc2"]
    w31, b31 = params["en_fc31"]
    w32, b32 = params["en_fc32"]
    w_d0, b_d0 = params["de_fc0"]
    w_d1, b_d1 = params["de_fc1"]
    w_d2, b_d2 = params["de_fc2"]
    w_d3, b_d3 = params["de_fc3"]

    w_e0p = w_e0.astype(cd)                                        # [F, 128]
    w_midp = jnp.stack([_pad2(w_e1, K, K), _pad2(w_e2, K, K),
                        _pad2(w_d0, K, K), _pad2(w_d1, K, K),
                        _pad2(w_d2, K, K)]).astype(cd)             # [5,128,128]
    w_e3p = jnp.zeros((K, 2 * K), w31.dtype)                       # fused heads
    w_e3p = w_e3p.at[:w31.shape[0], :LATENT].set(w31)
    w_e3p = w_e3p.at[:w32.shape[0], K:K + LATENT].set(w32)
    w_e3p = w_e3p.astype(cd)                                       # [128, 256]
    w_d3p = _pad2(w_d3, K, F_out).astype(cd)                       # [128, F_out]

    # Packed biases (f32, added post-MXU). Padded entries MUST stay zero.
    b_allp = jnp.zeros((8, BW), jnp.float32)
    b_allp = b_allp.at[0, :K].set(b_e0[0].astype(jnp.float32))
    b_allp = b_allp.at[1, :K // 2].set(b_e1[0].astype(jnp.float32))
    b_allp = b_allp.at[2, :K // 4].set(b_e2[0].astype(jnp.float32))
    b_allp = b_allp.at[3, :LATENT].set(b31[0].astype(jnp.float32))
    b_allp = b_allp.at[3, K:K + LATENT].set(b32[0].astype(jnp.float32))
    b_allp = b_allp.at[4, :K // 4].set(b_d0[0].astype(jnp.float32))
    b_allp = b_allp.at[5, :K // 2].set(b_d1[0].astype(jnp.float32))
    b_allp = b_allp.at[6, :K].set(b_d2[0].astype(jnp.float32))
    b_allp = b_allp.at[7, :feature_dim].set(b_d3[0].astype(jnp.float32))

    in_specs = [
        pl.BlockSpec((tile_b, feature_dim), lambda i: (i, 0)),   # x
        pl.BlockSpec((tile_b, K), lambda i: (i, 0)),             # eps (padded)
        pl.BlockSpec(w_e0p.shape, lambda i: (0, 0)),             # resident params
        pl.BlockSpec(w_midp.shape, lambda i: (0, 0, 0)),
        pl.BlockSpec(w_e3p.shape, lambda i: (0, 0)),
        pl.BlockSpec(w_d3p.shape, lambda i: (0, 0)),
        pl.BlockSpec(b_allp.shape, lambda i: (0, 0)),
    ]
    out_specs = [
        pl.BlockSpec((tile_b, F_out), lambda i: (i, 0)),
        pl.BlockSpec((tile_b, 2 * K), lambda i: (i, 0)),
    ]
    out_shape = (
        jax.ShapeDtypeStruct((B_pad, F_out), x.dtype),
        jax.ShapeDtypeStruct((B_pad, 2 * K), jnp.float32),
    )

    # VMEM limit: ~2x the double-buffered footprint (I/O tiles + resident
    # params + in-kernel f32 intermediates); floor 16 MiB (v5e scoped default),
    # cap 56 MiB (below v7x's 64 MiB physical VMEM).
    xbytes = jnp.dtype(x.dtype).itemsize
    cbytes = jnp.dtype(cd).itemsize
    io_bytes = 2 * tile_b * (feature_dim * xbytes + K * 4
                             + F_out * xbytes + 2 * K * 4)
    param_bytes = 2 * ((feature_dim * K + 5 * K * K + K * 2 * K
                        + K * F_out) * cbytes + 8 * BW * 4)
    scratch_bytes = 8 * tile_b * 2 * K * 4
    vmem_limit = int(min(56 << 20,
                         max(16 << 20,
                             2 * (io_bytes + param_bytes + scratch_bytes))))

    recon, mulv = pl.pallas_call(
        functools.partial(_vae_kernel, f_out=F_out),
        out_shape=out_shape,
        grid_spec=pltpu.PrefetchScalarGridSpec(
            num_scalar_prefetch=0,
            grid=grid,
            in_specs=in_specs,
            out_specs=out_specs,
        ),
        compiler_params=pltpu.CompilerParams(
            dimension_semantics=("parallel",),
            vmem_limit_bytes=vmem_limit),
    )(x2, eps_p, w_e0p, w_midp, w_e3p, w_d3p, b_allp)

    recon = recon[:B, :feature_dim]
    mu = mulv[:B, :LATENT]
    logvar = mulv[:B, K:K + LATENT]
    return recon, mu, logvar


def _reference_forward(x, eps, params):
    """Pure-JAX reference for correctness checking."""
    feature_dim = x.shape[-1]
    h = x.reshape(-1, feature_dim).astype(jnp.float32)

    def lin(name, v):
        w, b = params[name]
        return v @ w + b

    h = jax.nn.selu(lin("en_fc0", h))
    h = jax.nn.selu(lin("en_fc1", h))
    h = jax.nn.selu(lin("en_fc2", h))
    mu = lin("en_fc31", h)
    logvar = lin("en_fc32", h)
    z = mu + eps * jnp.exp(0.5 * logvar)
    d = jax.nn.selu(lin("de_fc0", z))
    d = jax.nn.selu(lin("de_fc1", d))
    d = jax.nn.selu(lin("de_fc2", d))
    recon = lin("de_fc3", d)
    return recon, mu, logvar


if __name__ == "__main__":
    feature_dim = 32
    batch = 16

    key = jax.random.PRNGKey(0)
    k_params, k_x, k_eps = jax.random.split(key, 3)

    params = init_vae_params(k_params, feature_dim)
    x = jax.random.normal(k_x, (batch, feature_dim), jnp.float32)
    eps = jax.random.normal(k_eps, (batch, LATENT), jnp.float32)

    # f32 path — strict check against the pure-JAX reference.
    recon, mu, logvar = vae_forward(x, eps, params)
    jax.block_until_ready((recon, mu, logvar))
    r_recon, r_mu, r_logvar = _reference_forward(x, eps, params)
    assert jnp.allclose(recon, r_recon, atol=1e-4, rtol=1e-4)
    assert jnp.allclose(mu, r_mu, atol=1e-5, rtol=1e-5)
    assert jnp.allclose(logvar, r_logvar, atol=1e-5, rtol=1e-5)

    # bf16 MXU-operand path (recommended on v6e/v7x) — loose check.
    recon_bf, mu_bf, lv_bf = vae_forward(x, eps, params,
                                         compute_dtype=jnp.bfloat16)
    jax.block_until_ready((recon_bf, mu_bf, lv_bf))
    assert jnp.allclose(recon_bf, r_recon, atol=1e-1, rtol=1e-1)
    assert jnp.allclose(mu_bf, r_mu, atol=1e-1, rtol=1e-1)
    assert jnp.allclose(lv_bf, r_logvar, atol=1e-1, rtol=1e-1)

    # Ragged batch exercising row padding (B=100 -> one 104-row tile).
    x_big = jax.random.normal(k_x, (100, feature_dim), jnp.float32)
    eps_big = jax.random.normal(k_eps, (100, LATENT), jnp.float32)
    recon_b, mu_b, lv_b = vae_forward(x_big, eps_big, params)
    jax.block_until_ready((recon_b, mu_b, lv_b))
    rb, mb, lb = _reference_forward(x_big, eps_big, params)
    assert jnp.allclose(recon_b, rb, atol=1e-4, rtol=1e-4)
    assert jnp.allclose(mu_b, mb, atol=1e-5, rtol=1e-5)
    assert jnp.allclose(lv_b, lb, atol=1e-5, rtol=1e-5)

    # Multi-tile path (forced small tile) to exercise the batch grid.
    recon_t, mu_t, lv_t = vae_forward(x_big, eps_big, params, tile_b=32)
    jax.block_until_ready((recon_t, mu_t, lv_t))
    assert jnp.allclose(recon_t, rb, atol=1e-4, rtol=1e-4)
    assert jnp.allclose(mu_t, mb, atol=1e-5, rtol=1e-5)
    assert jnp.allclose(lv_t, lb, atol=1e-5, rtol=1e-5)

    print("KERNEL_OK")
</pallas_src>

<mosaic_0001>
module attributes {stable_mosaic.version = 11 : i64} {
  func.func @_vae_kernel(%arg0: i32, %arg1: memref<16x32xf32, #tpu.memory_space<vmem>>, %arg2: memref<16x128xf32, #tpu.memory_space<vmem>>, %arg3: memref<32x128xf32, #tpu.memory_space<vmem>>, %arg4: memref<5x128x128xf32, #tpu.memory_space<vmem>>, %arg5: memref<128x256xf32, #tpu.memory_space<vmem>>, %arg6: memref<128x128xf32, #tpu.memory_space<vmem>>, %arg7: memref<8x256xf32, #tpu.memory_space<vmem>>, %arg8: memref<16x128xf32, #tpu.memory_space<vmem>>, %arg9: memref<16x256xf32, #tpu.memory_space<vmem>>) attributes {dimension_semantics = [#tpu.dimension_semantics<parallel>], iteration_bounds = array<i64: 1>, scalar_prefetch = 0 : i64, scratch_operands = 0 : i64, tpu.core_type = #tpu.core_type<tc>, window_params = [{transform_indices = @transform_0, window_bounds = array<i64: 16, 32>}, {transform_indices = @transform_1, window_bounds = array<i64: 16, 128>}, {pipeline_mode = #tpu.pipeline_mode<synchronous>, transform_indices = @transform_2, window_bounds = array<i64: 32, 128>}, {pipeline_mode = #tpu.pipeline_mode<synchronous>, transform_indices = @transform_3, window_bounds = array<i64: 5, 128, 128>}, {pipeline_mode = #tpu.pipeline_mode<synchronous>, transform_indices = @transform_4, window_bounds = array<i64: 128, 256>}, {pipeline_mode = #tpu.pipeline_mode<synchronous>, transform_indices = @transform_5, window_bounds = array<i64: 128, 128>}, {pipeline_mode = #tpu.pipeline_mode<synchronous>, transform_indices = @transform_6, window_bounds = array<i64: 8, 256>}, {transform_indices = @transform_7, window_bounds = array<i64: 16, 128>}, {transform_indices = @transform_8, window_bounds = array<i64: 16, 256>}]} {
    %c0 = arith.constant 0 : index
    %c0_0 = arith.constant 0 : index
    %0 = vector.load %arg1[%c0, %c0_0] : memref<16x32xf32, #tpu.memory_space<vmem>>, vector<16x32xf32>
    %c0_1 = arith.constant 0 : index
    %c0_2 = arith.constant 0 : index
    %1 = vector.load %arg3[%c0_1, %c0_2] : memref<32x128xf32, #tpu.memory_space<vmem>>, vector<32x128xf32>
    %c0_3 = arith.constant 0 : index
    %c0_4 = arith.constant 0 : index
    %2 = vector.load %arg7[%c0_3, %c0_4] : memref<8x256xf32, #tpu.memory_space<vmem>>, vector<1x128xf32>
    %cst = arith.constant dense<0.000000e+00> : vector<16x128xf32>
    %3 = tpu.matmul %0, %1, %cst {dimension_numbers = #tpu.dot_dimension_numbers<[1], [0], [0], [1], [0, 0, 1, 1], [], []>} : vector<16x32xf32>, vector<32x128xf32>, vector<16x128xf32> -> vector<16x128xf32>
    %4 = vector.broadcast %2 : vector<1x128xf32> to vector<16x128xf32>
    %5 = arith.addf %3, %4 : vector<16x128xf32>
    %cst_5 = arith.constant 0.000000e+00 : f32
    %6 = vector.broadcast %cst_5 : f32 to vector<16x128xf32>
    %7 = arith.cmpf ogt, %5, %6 : vector<16x128xf32>
    %cst_6 = arith.constant 0.000000e+00 : f32
    %8 = vector.broadcast %cst_6 : f32 to vector<16x128xf32>
    %9 = arith.minimumf %5, %8 : vector<16x128xf32>
    %10 = math.exp %9 : vector<16x128xf32>
    %cst_7 = arith.constant 1.000000e+00 : f32
    %11 = vector.broadcast %cst_7 : f32 to vector<16x128xf32>
    %12 = arith.subf %10, %11 : vector<16x128xf32>
    %cst_8 = arith.constant 1.67326319 : f32
    %13 = vector.broadcast %cst_8 : f32 to vector<16x128xf32>
    %14 = arith.mulf %13, %12 : vector<16x128xf32>
    %15 = arith.select %7, %5, %14 : vector<16x128xi1>, vector<16x128xf32>
    %cst_9 = arith.constant 1.05070102 : f32
    %16 = vector.broadcast %cst_9 : f32 to vector<16x128xf32>
    %17 = arith.mulf %16, %15 : vector<16x128xf32>
    %c0_10 = arith.constant 0 : index
    %c0_11 = arith.constant 0 : index
    %c0_12 = arith.constant 0 : index
    %18 = vector.load %arg4[%c0_10, %c0_11, %c0_12] : memref<5x128x128xf32, #tpu.memory_space<vmem>>, vector<1x128x128xf32>
    %19 = vector.shape_cast %18 : vector<1x128x128xf32> to vector<128x128xf32>
    %c1 = arith.constant 1 : index
    %c0_13 = arith.constant 0 : index
    %20 = vector.load %arg7[%c1, %c0_13] : memref<8x256xf32, #tpu.memory_space<vmem>>, vector<1x128xf32>
    %cst_14 = arith.constant dense<0.000000e+00> : vector<16x128xf32>
    %21 = tpu.matmul %17, %19, %cst_14 {dimension_numbers = #tpu.dot_dimension_numbers<[1], [0], [0], [1], [0, 0, 1, 1], [], []>} : vector<16x128xf32>, vector<128x128xf32>, vector<16x128xf32> -> vector<16x128xf32>
    %22 = vector.broadcast %20 : vector<1x128xf32> to vector<16x128xf32>
    %23 = arith.addf %21, %22 : vector<16x128xf32>
    %cst_15 = arith.constant 0.000000e+00 : f32
    %24 = vector.broadcast %cst_15 : f32 to vector<16x128xf32>
    %25 = arith.cmpf ogt, %23, %24 : vector<16x128xf32>
    %cst_16 = arith.constant 0.000000e+00 : f32
    %26 = vector.broadcast %cst_16 : f32 to vector<16x128xf32>
    %27 = arith.minimumf %23, %26 : vector<16x128xf32>
    %28 = math.exp %27 : vector<16x128xf32>
    %cst_17 = arith.constant 1.000000e+00 : f32
    %29 = vector.broadcast %cst_17 : f32 to vector<16x128xf32>
    %30 = arith.subf %28, %29 : vector<16x128xf32>
    %cst_18 = arith.constant 1.67326319 : f32
    %31 = vector.broadcast %cst_18 : f32 to vector<16x128xf32>
    %32 = arith.mulf %31, %30 : vector<16x128xf32>
    %33 = arith.select %25, %23, %32 : vector<16x128xi1>, vector<16x128xf32>
    %cst_19 = arith.constant 1.05070102 : f32
    %34 = vector.broadcast %cst_19 : f32 to vector<16x128xf32>
    %35 = arith.mulf %34, %33 : vector<16x128xf32>
    %c1_20 = arith.constant 1 : index
    %c0_21 = arith.constant 0 : index
    %c0_22 = arith.constant 0 : index
    %36 = vector.load %arg4[%c1_20, %c0_21, %c0_22] : memref<5x128x128xf32, #tpu.memory_space<vmem>>, vector<1x128x128xf32>
    %37 = vector.shape_cast %36 : vector<1x128x128xf32> to vector<128x128xf32>
    %c2 = arith.constant 2 : index
    %c0_23 = arith.constant 0 : index
    %38 = vector.load %arg7[%c2, %c0_23] : memref<8x256xf32, #tpu.memory_space<vmem>>, vector<1x128xf32>
    %cst_24 = arith.constant dense<0.000000e+00> : vector<16x128xf32>
    %39 = tpu.matmul %35, %37, %cst_24 {dimension_numbers = #tpu.dot_dimension_numbers<[1], [0], [0], [1], [0, 0, 1, 1], [], []>} : vector<16x128xf32>, vector<128x128xf32>, vector<16x128xf32> -> vector<16x128xf32>
    %40 = vector.broadcast %38 : vector<1x128xf32> to vector<16x128xf32>
    %41 = arith.addf %39, %40 : vector<16x128xf32>
    %cst_25 = arith.constant 0.000000e+00 : f32
    %42 = vector.broadcast %cst_25 : f32 to vector<16x128xf32>
    %43 = arith.cmpf ogt, %41, %42 : vector<16x128xf32>
    %cst_26 = arith.constant 0.000000e+00 : f32
    %44 = vector.broadcast %cst_26 : f32 to vector<16x128xf32>
    %45 = arith.minimumf %41, %44 : vector<16x128xf32>
    %46 = math.exp %45 : vector<16x128xf32>
    %cst_27 = arith.constant 1.000000e+00 : f32
    %47 = vector.broadcast %cst_27 : f32 to vector<16x128xf32>
    %48 = arith.subf %46, %47 : vector<16x128xf32>
    %cst_28 = arith.constant 1.67326319 : f32
    %49 = vector.broadcast %cst_28 : f32 to vector<16x128xf32>
    %50 = arith.mulf %49, %48 : vector<16x128xf32>
    %51 = arith.select %43, %41, %50 : vector<16x128xi1>, vector<16x128xf32>
    %cst_29 = arith.constant 1.05070102 : f32
    %52 = vector.broadcast %cst_29 : f32 to vector<16x128xf32>
    %53 = arith.mulf %52, %51 : vector<16x128xf32>
    %c0_30 = arith.constant 0 : index
    %c0_31 = arith.constant 0 : index
    %54 = vector.load %arg5[%c0_30, %c0_31] : memref<128x256xf32, #tpu.memory_space<vmem>>, vector<128x256xf32>
    %c3 = arith.constant 3 : index
    %c0_32 = arith.constant 0 : index
    %55 = vector.load %arg7[%c3, %c0_32] : memref<8x256xf32, #tpu.memory_space<vmem>>, vector<1x256xf32>
    %cst_33 = arith.constant dense<0.000000e+00> : vector<16x256xf32>
    %56 = tpu.matmul %53, %54, %cst_33 {dimension_numbers = #tpu.dot_dimension_numbers<[1], [0], [0], [1], [0, 0, 1, 1], [], []>} : vector<16x128xf32>, vector<128x256xf32>, vector<16x256xf32> -> vector<16x256xf32>
    %57 = vector.broadcast %55 : vector<1x256xf32> to vector<16x256xf32>
    %58 = arith.addf %56, %57 : vector<16x256xf32>
    %59 = vector.extract_strided_slice %58 {offsets = [0, 0], sizes = [16, 128], strides = [1, 1]} : vector<16x256xf32> to vector<16x128xf32>
    %60 = vector.extract_strided_slice %58 {offsets = [0, 128], sizes = [16, 128], strides = [1, 1]} : vector<16x256xf32> to vector<16x128xf32>
    %c0_34 = arith.constant 0 : index
    %c0_35 = arith.constant 0 : index
    %61 = vector.load %arg2[%c0_34, %c0_35] : memref<16x128xf32, #tpu.memory_space<vmem>>, vector<16x128xf32>
    %cst_36 = arith.constant 5.000000e-01 : f32
    %62 = vector.broadcast %cst_36 : f32 to vector<16x128xf32>
    %63 = arith.mulf %62, %60 : vector<16x128xf32>
    %64 = math.exp %63 : vector<16x128xf32>
    %65 = arith.mulf %61, %64 : vector<16x128xf32>
    %66 = arith.addf %59, %65 : vector<16x128xf32>
    %c2_37 = arith.constant 2 : index
    %c0_38 = arith.constant 0 : index
    %c0_39 = arith.constant 0 : index
    %67 = vector.load %arg4[%c2_37, %c0_38, %c0_39] : memref<5x128x128xf32, #tpu.memory_space<vmem>>, vector<1x128x128xf32>
    %68 = vector.shape_cast %67 : vector<1x128x128xf32> to vector<128x128xf32>
    %c4 = arith.constant 4 : index
    %c0_40 = arith.constant 0 : index
    %69 = vector.load %arg7[%c4, %c0_40] : memref<8x256xf32, #tpu.memory_space<vmem>>, vector<1x128xf32>
    %cst_41 = arith.constant dense<0.000000e+00> : vector<16x128xf32>
    %70 = tpu.matmul %66, %68, %cst_41 {dimension_numbers = #tpu.dot_dimension_numbers<[1], [0], [0], [1], [0, 0, 1, 1], [], []>} : vector<16x128xf32>, vector<128x128xf32>, vector<16x128xf32> -> vector<16x128xf32>
    %71 = vector.broadcast %69 : vector<1x128xf32> to vector<16x128xf32>
    %72 = arith.addf %70, %71 : vector<16x128xf32>
    %cst_42 = arith.constant 0.000000e+00 : f32
    %73 = vector.broadcast %cst_42 : f32 to vector<16x128xf32>
    %74 = arith.cmpf ogt, %72, %73 : vector<16x128xf32>
    %cst_43 = arith.constant 0.000000e+00 : f32
    %75 = vector.broadcast %cst_43 : f32 to vector<16x128xf32>
    %76 = arith.minimumf %72, %75 : vector<16x128xf32>
    %77 = math.exp %76 : vector<16x128xf32>
    %cst_44 = arith.constant 1.000000e+00 : f32
    %78 = vector.broadcast %cst_44 : f32 to vector<16x128xf32>
    %79 = arith.subf %77, %78 : vector<16x128xf32>
    %cst_45 = arith.constant 1.67326319 : f32
    %80 = vector.broadcast %cst_45 : f32 to vector<16x128xf32>
    %81 = arith.mulf %80, %79 : vector<16x128xf32>
    %82 = arith.select %74, %72, %81 : vector<16x128xi1>, vector<16x128xf32>
    %cst_46 = arith.constant 1.05070102 : f32
    %83 = vector.broadcast %cst_46 : f32 to vector<16x128xf32>
    %84 = arith.mulf %83, %82 : vector<16x128xf32>
    %c3_47 = arith.constant 3 : index
    %c0_48 = arith.constant 0 : index
    %c0_49 = arith.constant 0 : index
    %85 = vector.load %arg4[%c3_47, %c0_48, %c0_49] : memref<5x128x128xf32, #tpu.memory_space<vmem>>, vector<1x128x128xf32>
    %86 = vector.shape_cast %85 : vector<1x128x128xf32> to vector<128x128xf32>
    %c5 = arith.constant 5 : index
    %c0_50 = arith.constant 0 : index
    %87 = vector.load %arg7[%c5, %c0_50] : memref<8x256xf32, #tpu.memory_space<vmem>>, vector<1x128xf32>
    %cst_51 = arith.constant dense<0.000000e+00> : vector<16x128xf32>
    %88 = tpu.matmul %84, %86, %cst_51 {dimension_numbers = #tpu.dot_dimension_numbers<[1], [0], [0], [1], [0, 0, 1, 1], [], []>} : vector<16x128xf32>, vector<128x128xf32>, vector<16x128xf32> -> vector<16x128xf32>
    %89 = vector.broadcast %87 : vector<1x128xf32> to vector<16x128xf32>
    %90 = arith.addf %88, %89 : vector<16x128xf32>
    %cst_52 = arith.constant 0.000000e+00 : f32
    %91 = vector.broadcast %cst_52 : f32 to vector<16x128xf32>
    %92 = arith.cmpf ogt, %90, %91 : vector<16x128xf32>
    %cst_53 = arith.constant 0.000000e+00 : f32
    %93 = vector.broadcast %cst_53 : f32 to vector<16x128xf32>
    %94 = arith.minimumf %90, %93 : vector<16x128xf32>
    %95 = math.exp %94 : vector<16x128xf32>
    %cst_54 = arith.constant 1.000000e+00 : f32
    %96 = vector.broadcast %cst_54 : f32 to vector<16x128xf32>
    %97 = arith.subf %95, %96 : vector<16x128xf32>
    %cst_55 = arith.constant 1.67326319 : f32
    %98 = vector.broadcast %cst_55 : f32 to vector<16x128xf32>
    %99 = arith.mulf %98, %97 : vector<16x128xf32>
    %100 = arith.select %92, %90, %99 : vector<16x128xi1>, vector<16x128xf32>
    %cst_56 = arith.constant 1.05070102 : f32
    %101 = vector.broadcast %cst_56 : f32 to vector<16x128xf32>
    %102 = arith.mulf %101, %100 : vector<16x128xf32>
    %c4_57 = arith.constant 4 : index
    %c0_58 = arith.constant 0 : index
    %c0_59 = arith.constant 0 : index
    %103 = vector.load %arg4[%c4_57, %c0_58, %c0_59] : memref<5x128x128xf32, #tpu.memory_space<vmem>>, vector<1x128x128xf32>
    %104 = vector.shape_cast %103 : vector<1x128x128xf32> to vector<128x128xf32>
    %c6 = arith.constant 6 : index
    %c0_60 = arith.constant 0 : index
    %105 = vector.load %arg7[%c6, %c0_60] : memref<8x256xf32, #tpu.memory_space<vmem>>, vector<1x128xf32>
    %cst_61 = arith.constant dense<0.000000e+00> : vector<16x128xf32>
    %106 = tpu.matmul %102, %104, %cst_61 {dimension_numbers = #tpu.dot_dimension_numbers<[1], [0], [0], [1], [0, 0, 1, 1], [], []>} : vector<16x128xf32>, vector<128x128xf32>, vector<16x128xf32> -> vector<16x128xf32>
    %107 = vector.broadcast %105 : vector<1x128xf32> to vector<16x128xf32>
    %108 = arith.addf %106, %107 : vector<16x128xf32>
    %cst_62 = arith.constant 0.000000e+00 : f32
    %109 = vector.broadcast %cst_62 : f32 to vector<16x128xf32>
    %110 = arith.cmpf ogt, %108, %109 : vector<16x128xf32>
    %cst_63 = arith.constant 0.000000e+00 : f32
    %111 = vector.broadcast %cst_63 : f32 to vector<16x128xf32>
    %112 = arith.minimumf %108, %111 : vector<16x128xf32>
    %113 = math.exp %112 : vector<16x128xf32>
    %cst_64 = arith.constant 1.000000e+00 : f32
    %114 = vector.broadcast %cst_64 : f32 to vector<16x128xf32>
    %115 = arith.subf %113, %114 : vector<16x128xf32>
    %cst_65 = arith.constant 1.67326319 : f32
    %116 = vector.broadcast %cst_65 : f32 to vector<16x128xf32>
    %117 = arith.mulf %116, %115 : vector<16x128xf32>
    %118 = arith.select %110, %108, %117 : vector<16x128xi1>, vector<16x128xf32>
    %cst_66 = arith.constant 1.05070102 : f32
    %119 = vector.broadcast %cst_66 : f32 to vector<16x128xf32>
    %120 = arith.mulf %119, %118 : vector<16x128xf32>
    %c0_67 = arith.constant 0 : index
    %c0_68 = arith.constant 0 : index
    %121 = vector.load %arg6[%c0_67, %c0_68] : memref<128x128xf32, #tpu.memory_space<vmem>>, vector<128x128xf32>
    %c7 = arith.constant 7 : index
    %c0_69 = arith.constant 0 : index
    %122 = vector.load %arg7[%c7, %c0_69] : memref<8x256xf32, #tpu.memory_space<vmem>>, vector<1x128xf32>
    %cst_70 = arith.constant dense<0.000000e+00> : vector<16x128xf32>
    %123 = tpu.matmul %120, %121, %cst_70 {dimension_numbers = #tpu.dot_dimension_numbers<[1], [0], [0], [1], [0, 0, 1, 1], [], []>} : vector<16x128xf32>, vector<128x128xf32>, vector<16x128xf32> -> vector<16x128xf32>
    %124 = vector.broadcast %122 : vector<1x128xf32> to vector<16x128xf32>
    %125 = arith.addf %123, %124 : vector<16x128xf32>
    %c0_71 = arith.constant 0 : index
    %c0_72 = arith.constant 0 : index
    %126 = vector.load %arg8[%c0_71, %c0_72] : memref<16x128xf32, #tpu.memory_space<vmem>>, vector<16x128xf32>
    tpu.vector_store %arg8[%c0_71, %c0_72], %125 {strides = array<i32>} : memref<16x128xf32, #tpu.memory_space<vmem>>, vector<16x128xf32>,
    %c0_73 = arith.constant 0 : index
    %c0_74 = arith.constant 0 : index
    %127 = vector.load %arg9[%c0_73, %c0_74] : memref<16x256xf32, #tpu.memory_space<vmem>>, vector<16x256xf32>
    tpu.vector_store %arg9[%c0_73, %c0_74], %58 {strides = array<i32>} : memref<16x256xf32, #tpu.memory_space<vmem>>, vector<16x256xf32>,
    return
  }
  func.func @transform_0(%arg0: i32) -> (i32, i32) {
    %c0_i32 = arith.constant 0 : i32
    %c0_i32_0 = arith.constant 0 : i32
    return %arg0, %c0_i32 : i32, i32
  }
  func.func @transform_1(%arg0: i32) -> (i32, i32) {
    %c0_i32 = arith.constant 0 : i32
    %c0_i32_0 = arith.constant 0 : i32
    return %arg0, %c0_i32 : i32, i32
  }
  func.func @transform_2(%arg0: i32) -> (i32, i32) {
    %c0_i32 = arith.constant 0 : i32
    %c0_i32_0 = arith.constant 0 : i32
    %c0_i32_1 = arith.constant 0 : i32
    return %c0_i32, %c0_i32_0 : i32, i32
  }
  func.func @transform_3(%arg0: i32) -> (i32, i32, i32) {
    %c0_i32 = arith.constant 0 : i32
    %c0_i32_0 = arith.constant 0 : i32
    %c0_i32_1 = arith.constant 0 : i32
    %c0_i32_2 = arith.constant 0 : i32
    return %c0_i32, %c0_i32_0, %c0_i32_1 : i32, i32, i32
  }
  func.func @transform_4(%arg0: i32) -> (i32, i32) {
    %c0_i32 = arith.constant 0 : i32
    %c0_i32_0 = arith.constant 0 : i32
    %c0_i32_1 = arith.constant 0 : i32
    return %c0_i32, %c0_i32_0 : i32, i32
  }
  func.func @transform_5(%arg0: i32) -> (i32, i32) {
    %c0_i32 = arith.constant 0 : i32
    %c0_i32_0 = arith.constant 0 : i32
    %c0_i32_1 = arith.constant 0 : i32
    return %c0_i32, %c0_i32_0 : i32, i32
  }
  func.func @transform_6(%arg0: i32) -> (i32, i32) {
    %c0_i32 = arith.constant 0 : i32
    %c0_i32_0 = arith.constant 0 : i32
    %c0_i32_1 = arith.constant 0 : i32
    return %c0_i32, %c0_i32_0 : i32, i32
  }
  func.func @transform_7(%arg0: i32) -> (i32, i32) {
    %c0_i32 = arith.constant 0 : i32
    %c0_i32_0 = arith.constant 0 : i32
    return %arg0, %c0_i32 : i32, i32
  }
  func.func @transform_8(%arg0: i32) -> (i32, i32) {
    %c0_i32 = arith.constant 0 : i32
    %c0_i32_0 = arith.constant 0 : i32
    return %arg0, %c0_i32 : i32, i32
  }
}

</mosaic_0001>

<bundles_post_ra>
// kernel: vae_forward.1
= control target key start
LH: loop header
LB: loop body
LE: loop exit
PB: predicated region body
PF: predicated region fallthrough
CT: control target
= control target key end

     0   :  { %vm36_vm0 = vcmask 261120   ;;  %s2139_s0 = inlined_call_operand.vmem [shape: f32[16,32], index: 0, kind: input, shape index: {}]   ;;  %s2140_s1 = inlined_call_operand.vmem [shape: f32[16,128], index: 1, kind: input, shape index: {}]   ;;  %s2141_s2 = inlined_call_operand.vmem [shape: f32[32,128], index: 2, kind: input, shape index: {}]   ;;  %s2142_s3 = inlined_call_operand.vmem [shape: f32[5,128,128], index: 3, kind: input, shape index: {}]   ;;  %s2143_s4 = inlined_call_operand.vmem [shape: f32[128,256], index: 4, kind: input, shape index: {}]   ;;  %s2144_s5 = inlined_call_operand.vmem [shape: f32[128,128], index: 5, kind: input, shape index: {}]   ;;  %s2145_s6 = inlined_call_operand.vmem [shape: f32[8,256], index: 6, kind: input, shape index: {}]   ;;  %s2146_s7 = inlined_call_operand.hbm [shape: f32[16,128], index: 7, kind: output, shape index: {0}]   ;;  %s2147_s8 = inlined_call_operand.vmem [shape: f32[16,256], index: 8, kind: output, shape index: {1}]  }
   0x1   :  { %v31_v0 = vld [vmem:[%s2141_s2] sm:$0xff]  ;;  %v32_v1 = vld [vmem:[%s2141_s2 + $0x8] sm:$0xff]  ;;  %v33_v2 = vld [vmem:[%s2141_s2 + $0x10] sm:$0xff] }
   0x2   :  { %v1344_v3 = vpack.c.bf16 %v32_v1, %v31_v0  ;;  %v34_v4 = vld [vmem:[%s2141_s2 + $0x18] sm:$0xff]  ;;  %v29_v5 = vld [vmem:[%s2139_s0] sm:$0xff]  ;;  %v135_v8 = vld [vmem:[%s2142_s3 + $0x8] sm:$0xff] }
   0x3   :  { %v1348_v6 = vpack.c.bf16 %v34_v4, %v33_v2  ;;  %1131 = vmatprep.mubr.msk.f32.mxu0 %vm36_vm0, %v29_v5  ;;  %v134_v7 = vld [vmem:[%s2142_s3] sm:$0xff]  ;;  %v136_v9 = vld [vmem:[%s2142_s3 + $0x10] sm:$0xff]  ;;  %v137_v11 = vld [vmem:[%s2142_s3 + $0x18] sm:$0xff] }
   0x4   :  { %1345 = vmatprep.subr.bf16.mxu0 %v1344_v3  ;;  %v1352_v10 = vpack.c.bf16 %v135_v8, %v134_v7 }
   0x5   :  { %14 = vsyncpa [#allocation3], 0  ;;  %1347 = vmatpush3.bf16.msra.mxu0 %v1344_v3  ;;  %v1356_v12 = vpack.c.bf16 %v137_v11, %v136_v9  ;;  %v30_v13 = vld [vmem:[%s2139_s0 + $0x8] sm:$0xff]  ;;  %v138_v14 = vld [vmem:[%s2142_s3 + $0x20] sm:$0xff]  ;;  %s1633_s20 = smov [#allocation2]  }
   0x6   :  { %1349 = vmatprep.subr.bf16.mxu0 %v1348_v6  ;;  %1353 = vmatprep.subr.bf16.mxu1 %v1352_v10  ;;  %v139_v15 = vld [vmem:[%s2142_s3 + $0x28] sm:$0xff]  ;;  %v140_v17 = vld [vmem:[%s2142_s3 + $0x30] sm:$0xff]  ;;  %v141_v18 = vld [vmem:[%s2142_s3 + $0x38] sm:$0xff]  ;;  %s915_s2 = sshll.u32 %s1633_s20, 4  ;;  %s916_s2 = int_to_ptr.vmem [resolvable:$true] %s915_s2 }
   0x7   :  { %1355 = vmatpush3.bf16.msra.mxu1 %v1352_v10  ;;  %v1360_v16 = vpack.c.bf16 %v139_v15, %v138_v14  ;;  %v1364_v19 = vpack.c.bf16 %v141_v18, %v140_v17  ;;  %v142_v20 = vld [vmem:[%s2142_s3 + $0x40] sm:$0xff]  ;;  %v143_v21 = vld [vmem:[%s2142_s3 + $0x48] sm:$0xff]  ;;  %v144_v23 = vld [vmem:[%s2142_s3 + $0x50] sm:$0xff]  ;;  %s1608_s21 = scalar_lea.vmem %s916_s2, 256  ;;  %p1613_p1 = scmp.lt.s32.totalorder %s916_s2, %s916_s2 }
   0x8   :  { %1357 = vmatprep.subr.bf16.mxu1 %v1356_v12  ;;  %v1368_v22 = vpack.c.bf16 %v143_v21, %v142_v20  ;;  %v145_v24 = vld [vmem:[%s2142_s3 + $0x58] sm:$0xff]  ;;  %v146_v26 = vld [vmem:[%s2142_s3 + $0x60] sm:$0xff]  ;;  %v147_v27 = vld [vmem:[%s2142_s3 + $0x68] sm:$0xff]  ;;  %p1609_p0 = scmp.ne.s32.totalorder %s916_s2, %s1608_s21  ;;  %p1614_p2 = scmp.lt.s32.totalorder %s1608_s21, %s1608_s21 }
   0x9   :  { %1351 = vmatpush3.bf16.msra.mxu0 %v1348_v6  ;;  %v1372_v25 = vpack.c.bf16 %v145_v24, %v144_v23  ;;  %v1376_v28 = vpack.c.bf16 %v147_v27, %v146_v26  ;;  %v148_v29 = vld [vmem:[%s2142_s3 + $0x70] sm:$0xff]  ;;  %v149_v30 = vld [vmem:[%s2142_s3 + $0x78] sm:$0xff]  ;;  %v936_v32 = vld [vmem:[%s2142_s3 + $0x80] sm:$0xff] }
   0xa   :  { %v1380_v31 = vpack.c.bf16 %v149_v30, %v148_v29  ;;  %v937_v33 = vld [vmem:[%s2142_s3 + $0x88] sm:$0xff]  ;;  %v938_v34 = vld [vmem:[%s2142_s3 + $0x90] sm:$0xff]  ;;  %v939_v36 = vld [vmem:[%s2142_s3 + $0x98] sm:$0xff]  ;;  %p1615_p3 = por %p1614_p2, %p1613_p1 }
   0xb   :  { %1359 = vmatpush3.bf16.msra.mxu1 %v1356_v12  ;;  %v1384_v35 = vpack.c.bf16 %v937_v33, %v936_v32  ;;  %v1388_v37 = vpack.c.bf16 %v939_v36, %v938_v34  ;;  %v35_v38 = vld [vmem:[%s2145_s6] ss:$0 sm:$0xff]  ;;  %v941_v58 = vld [vmem:[%s2142_s3 + $0xa8] sm:$0xff]  ;;  %v942_v60 = vld [vmem:[%s2142_s3 + $0xb0] sm:$0xff] }
   0xc   :  { %1132 = vmatmul.mubr.msk.f32.vlgmr.msra.gmra.mrb[0].mxu0 %vm36_vm0, %v30_v13  ;;  %1361 = vmatprep.subr.bf16.mxu1 %v1360_v16  ;;  %v940_v57 = vld [vmem:[%s2142_s3 + $0xa0] sm:$0xff]  ;;  %v943_v61 = vld [vmem:[%s2142_s3 + $0xb8] sm:$0xff]  ;;  %v945_v0 = vld [vmem:[%s2142_s3 + $0xc8] sm:$0xff]  ;;  %p1616_p4 = pnand %p1615_p3, %p1609_p0 }
   0xd   :  { %1385 = vmatprep.subr.bf16.mxu0 %v1384_v35  ;;  %v1392_v59 = vpack.c.bf16 %v941_v58, %v940_v57  ;;  %v1396_v62 = vpack.c.bf16 %v943_v61, %v942_v60  ;;  %v944_v63 = vld [vmem:[%s2142_s3 + $0xc0] sm:$0xff]  ;;  %v946_v2 = vld [vmem:[%s2142_s3 + $0xd0] sm:$0xff]  ;;  %v947_v3 = vld [vmem:[%s2142_s3 + $0xd8] sm:$0xff] }
   0xe   :  { %1387 = vmatpush3.bf16.msra.mxu0 %v1384_v35  ;;  %v1400_v1 = vpack.c.bf16 %v945_v0, %v944_v63  ;;  %v1404_v4 = vpack.c.bf16 %v947_v3, %v946_v2  ;;  %v948_v5 = vld [vmem:[%s2142_s3 + $0xe0] sm:$0xff]  ;;  %v949_v6 = vld [vmem:[%s2142_s3 + $0xe8] sm:$0xff]  ;;  %v950_v8 = vld [vmem:[%s2142_s3 + $0xf0] sm:$0xff] }
   0xf   :  { %1363 = vmatpush3.bf16.msra.mxu1 %v1360_v16  ;;  %1389 = vmatprep.subr.bf16.mxu0 %v1388_v37  ;;  %v1408_v7 = vpack.c.bf16 %v949_v6, %v948_v5  ;;  %v951_v9 = vld [vmem:[%s2142_s3 + $0xf8] sm:$0xff]  ;;  %v352_v11 = vld [vmem:[%s2143_s4 + $0x8] sm:$0xff]  ;;  %v351_v13 = vld [vmem:[%s2143_s4] sm:$0xff] }
  0x10   :  { %1365 = vmatprep.subr.bf16.mxu1 %v1364_v19  ;;  %v1412_v10 = vpack.c.bf16 %v951_v9, %v950_v8  ;;  %v354_v12 = vld [vmem:[%s2143_s4 + $0x18] sm:$0xff]  ;;  %v353_v15 = vld [vmem:[%s2143_s4 + $0x10] sm:$0xff]  ;;  %v356_v16 = vld [vmem:[%s2143_s4 + $0x28] sm:$0xff] }
  0x11   :  { %v1416_v14 = vpack.c.bf16 %v354_v12, %v352_v11  ;;  %v358_v17 = vld [vmem:[%s2143_s4 + $0x38] sm:$0xff]  ;;  %v1418_v18 = vpack.c.bf16 %v353_v15, %v351_v13  ;;  %v355_v20 = vld [vmem:[%s2143_s4 + $0x20] sm:$0xff]  ;;  %v357_v21 = vld [vmem:[%s2143_s4 + $0x30] sm:$0xff] }
  0x12   :  { %1391 = vmatpush3.bf16.msra.mxu0 %v1388_v37  ;;  %v150_v23 = vld [vmem:[%s2145_s6 + $0x1] ss:$0 sm:$0xff]  ;;  %v369_v58 = vld [vmem:[%s2143_s4 + $0x90] sm:$0xff]  ;;  %v372_v60 = vld [vmem:[%s2143_s4 + $0xa8] sm:$0xff] }
  0x13   :  { %1367 = vmatpush3.bf16.msra.mxu1 %v1364_v19  ;;  %1393 = vmatprep.subr.bf16.mxu0 %v1392_v59  ;;  %v1420_v19 = vpack.c.bf16 %v358_v17, %v356_v16  ;;  %v367_v57 = vld [vmem:[%s2143_s4 + $0x80] sm:$0xff]  ;;  %v374_v61 = vld [vmem:[%s2143_s4 + $0xb8] sm:$0xff]  ;;  %v373_v0 = vld [vmem:[%s2143_s4 + $0xb0] sm:$0xff] }
  0x14   :  { %1369 = vmatprep.subr.bf16.mxu1 %v1368_v22  ;;  %v371_v63 = vld [vmem:[%s2143_s4 + $0xa0] sm:$0xff]  ;;  %v376_v2 = vld [vmem:[%s2143_s4 + $0xc8] sm:$0xff]  ;;  %v378_v3 = vld [vmem:[%s2143_s4 + $0xd8] sm:$0xff] }
  0x15   :  { %v375_v5 = vld [vmem:[%s2143_s4 + $0xc0] sm:$0xff]  ;;  %v377_v6 = vld [vmem:[%s2143_s4 + $0xd0] sm:$0xff]  ;;  %v380_v8 = vld [vmem:[%s2143_s4 + $0xe8] sm:$0xff] }
  0x16   :  { %1395 = vmatpush3.bf16.msra.mxu0 %v1392_v59  ;;  %v1434_v59 = vpack.c.bf16 %v369_v58, %v367_v57  ;;  %v382_v9 = vld [vmem:[%s2143_s4 + $0xf8] sm:$0xff]  ;;  %v379_v11 = vld [vmem:[%s2143_s4 + $0xe0] sm:$0xff]  ;;  %v381_v12 = vld [vmem:[%s2143_s4 + $0xf0] sm:$0xff] }
  0x17   :  { %1371 = vmatpush3.bf16.msra.mxu1 %v1368_v22  ;;  %1397 = vmatprep.subr.bf16.mxu0 %v1396_v62  ;;  %v1422_v22 = vpack.c.bf16 %v357_v21, %v355_v20  ;;  %v1446_v13 = vpack.c.bf16 %v381_v12, %v379_v11  ;;  %v955_v15 = vld [vmem:[%s2142_s3 + $0x100] sm:$0xff]  ;;  %v956_v16 = vld [vmem:[%s2142_s3 + $0x108] sm:$0xff]  ;;  %v957_v17 = vld [vmem:[%s2142_s3 + $0x110] sm:$0xff] }
  0x18   :  { %1373 = vmatprep.subr.bf16.mxu1 %v1372_v25  ;;  %v259_v21 = vld [vmem:[%s2145_s6 + $0x2] ss:$0 sm:$0xff] }
  0x19   :  { %v973_v58 = vld [vmem:[%s2142_s3 + $0x180] sm:$0xff] }
  0x1a   :  { %1399 = vmatpush3.bf16.msra.mxu0 %v1396_v62  ;;  %v1436_v62 = vpack.c.bf16 %v374_v61, %v372_v60  ;;  %v975_v60 = vld [vmem:[%s2142_s3 + $0x190] sm:$0xff] }
  0x1b   :  { %1375 = vmatpush3.bf16.msra.mxu1 %v1372_v25  ;;  %1401 = vmatprep.subr.bf16.mxu0 %v1400_v1 }
  0x1c   :  { %1377 = vmatprep.subr.bf16.mxu1 %v1376_v28 }
  0x1e   :  { %1403 = vmatpush3.bf16.msra.mxu0 %v1400_v1  ;;  %v1438_v1 = vpack.c.bf16 %v373_v0, %v371_v63  ;;  %v386_v0 = vlaneseq }
  0x1f   :  { %1379 = vmatpush3.bf16.msra.mxu1 %v1376_v28  ;;  %1405 = vmatprep.subr.bf16.mxu0 %v1404_v4 }
  0x20   :  { %1381 = vmatprep.subr.bf16.mxu1 %v1380_v31 }
  0x22   :  { %1407 = vmatpush3.bf16.msra.mxu0 %v1404_v4  ;;  %v1440_v4 = vpack.c.bf16 %v378_v3, %v376_v2  ;;  %v954_v3 = vld [vmem:[%s2145_s6 + $0x3] ss:$8 sm:$0x3] }
  0x23   :  { %1383 = vmatpush3.bf16.msra.mxu1 %v1380_v31  ;;  %1409 = vmatprep.subr.bf16.mxu0 %v1408_v7 }
  0x24   :  { %1417 = vmatprep.subr.bf16.mxu1 %v1416_v14  ;;  %v1632_v14 = vmov 0.0  }
  0x26   :  { %1411 = vmatpush3.bf16.msra.mxu0 %v1408_v7  ;;  %v1442_v7 = vpack.c.bf16 %v377_v6, %v375_v5 }
  0x27   :  { %1413 = vmatprep.subr.bf16.mxu0 %v1412_v10 }
  0x2a   :  { %1415 = vmatpush3.bf16.msra.mxu0 %v1412_v10  ;;  %v1444_v10 = vpack.c.bf16 %v382_v9, %v380_v8 }
  0xdf   :  { %v1133_v39 = vpop.f32.mrb[0].mxu0 }
  0xe0   :  { %v115_v40 = vadd.f32 %v1133_v39, %v35_v38  ;;  %v109_v41 = vpop.f32.mrb[1].mxu0 }
  0xe1   :  { %v110_v42 = vadd.f32 %v109_v41, %v35_v38 }
  0xe2   :  { %v121_v43 = vmin.f32 %v115_v40, 0.0  ;;  %vm119_vm1 = vcmp.gt.f32.partialorder %v115_v40, 0.0 }
  0xe3   :  { %v120_v44 = vmin.f32 %v110_v42, 0.0  ;;  %vm118_vm2 = vcmp.gt.f32.partialorder %v110_v42, 0.0 }
  0xe4   :  { %v124_v45 = vmul.f32 1.442695, %v121_v43  ;;  %v362_v43 = vld [vmem:[%s2143_s4 + $0x58] sm:$0xff] }
  0xe5   :  { %v122_v46 = vmul.f32 1.442695, %v120_v44 }
  0xe6   :  { %1580 = vpow2.f32 %v124_v45  ;;  %v359_v45 = vld [vmem:[%s2143_s4 + $0x40] sm:$0xff] }
  0xe7   :  { %1582 = vpow2.f32 %v122_v46  ;;  %v361_v46 = vld [vmem:[%s2143_s4 + $0x50] sm:$0xff] }
  0xf0   :  { %v1581_v47 = vpop.eup %1580 }
  0xf1   :  { %v1583_v48 = vpop.eup %1582  ;;  %v933_v49 = vadd.f32 -1.0, %v1581_v47  ;;  %v1426_v47 = vpack.c.bf16 %v361_v46, %v359_v45  ;;  %v963_v46 = vld [vmem:[%s2142_s3 + $0x140] sm:$0xff] }
  0xf2   :  { %v932_v50 = vadd.f32 -1.0, %v1583_v48  ;;  %v364_v48 = vld [vmem:[%s2143_s4 + $0x68] sm:$0xff] }
  0xf3   :  { %v129_v51 = vmul.f32 1.6732632, %v933_v49  ;;  %v366_v49 = vld [vmem:[%s2143_s4 + $0x78] sm:$0xff] }
  0xf4   :  { %v128_v52 = vmul.f32 1.6732632, %v932_v50  ;;  %v1428_v50 = vpack.c.bf16 %v366_v49, %v364_v48  ;;  %v965_v49 = vld [vmem:[%s2142_s3 + $0x150] sm:$0xff] }
  0xf5   :  { %v131_v53 = vsel %vm119_vm1, %v115_v40, %v129_v51  ;;  %v363_v51 = vld [vmem:[%s2143_s4 + $0x60] sm:$0xff] }
  0xf6   :  { %v130_v54 = vsel %vm118_vm2, %v110_v42, %v128_v52  ;;  %v133_v56 = vmul.f32 1.050701, %v131_v53  ;;  %v360_v42 = vld [vmem:[%s2143_s4 + $0x48] sm:$0xff]  ;;  %v365_v52 = vld [vmem:[%s2143_s4 + $0x70] sm:$0xff] }
  0xf7   :  { %v132_v55 = vmul.f32 1.050701, %v130_v54  ;;  %v1424_v44 = vpack.c.bf16 %v362_v43, %v360_v42  ;;  %v1430_v53 = vpack.c.bf16 %v365_v52, %v363_v51  ;;  %v368_v54 = vld [vmem:[%s2143_s4 + $0x88] sm:$0xff]  ;;  %v961_v43 = vld [vmem:[%s2142_s3 + $0x130] sm:$0xff]  ;;  %v967_v51 = vld [vmem:[%s2142_s3 + $0x160] sm:$0xff] }
  0xf9   :  { %1166 = vmatprep.mubr.f32.mxu1 %v132_v55  ;;  %v370_v55 = vld [vmem:[%s2143_s4 + $0x98] sm:$0xff] }
  0xfa   :  { %1167 = vmatmul.mubr.f32.vlgmr.msra.gmra.mrb[0].mxu1 %v133_v56  ;;  %v1432_v56 = vpack.c.bf16 %v370_v55, %v368_v54  ;;  %v969_v55 = vld [vmem:[%s2142_s3 + $0x170] sm:$0xff] }
  0xfb   :  { %1419 = vmatpush1.bf16.msra.mxu1 %v1418_v18  ;;  %460 = vmatprep.mubr.f32.mxu1 %v1632_v14  ;;  %v1448_v18 = vpack.c.bf16 %v956_v16, %v955_v15 }
  0xfc   :  { %1421 = vmatprep.subr.bf16.mxu1 %v1420_v19  ;;  %v958_v19 = vld [vmem:[%s2142_s3 + $0x118] sm:$0xff] }
  0xfd   :  { %v1452_v20 = vpack.c.bf16 %v958_v19, %v957_v17  ;;  %1449 = vmatprep.subr.bf16.mxu0 %v1448_v18  ;;  %v473_v19 = vld [vmem:[%s2140_s1] sm:$0xff] }
  0xff   :  { %1423 = vmatpush1.bf16.msra.mxu1 %v1422_v22 }
 0x100   :  { %1425 = vmatprep.subr.bf16.mxu1 %v1424_v44  ;;  %v962_v44 = vld [vmem:[%s2142_s3 + $0x138] sm:$0xff] }
 0x101   :  { %v1460_v45 = vpack.c.bf16 %v962_v44, %v961_v43  ;;  %v988_v43 = vld [vmem:[%s2142_s3 + $0x1f8] sm:$0xff] }
 0x103   :  { %1427 = vmatpush1.bf16.msra.mxu1 %v1426_v47  ;;  %v964_v47 = vld [vmem:[%s2142_s3 + $0x148] sm:$0xff] }
 0x104   :  { %1429 = vmatprep.subr.bf16.mxu1 %v1428_v50  ;;  %v1464_v48 = vpack.c.bf16 %v964_v47, %v963_v46  ;;  %v966_v50 = vld [vmem:[%s2142_s3 + $0x158] sm:$0xff]  ;;  %v992_v46 = vld [vmem:[%s2142_s3 + $0x208] sm:$0xff]  ;;  %v993_v47 = vld [vmem:[%s2142_s3 + $0x210] sm:$0xff] }
 0x105   :  { %v1468_v52 = vpack.c.bf16 %v966_v50, %v965_v49  ;;  %v994_v49 = vld [vmem:[%s2142_s3 + $0x218] sm:$0xff] }
 0x106   :  { %v1516_v50 = vpack.c.bf16 %v994_v49, %v993_v47  ;;  %v816_v49 = vld [vmem:[%s2144_s5 + $0x20] sm:$0xff] }
 0x107   :  { %1431 = vmatpush1.bf16.msra.mxu1 %v1430_v53  ;;  %v968_v53 = vld [vmem:[%s2142_s3 + $0x168] sm:$0xff] }
 0x108   :  { %1433 = vmatprep.subr.bf16.mxu1 %v1432_v56  ;;  %v1472_v54 = vpack.c.bf16 %v968_v53, %v967_v51  ;;  %v970_v56 = vld [vmem:[%s2142_s3 + $0x178] sm:$0xff]  ;;  %v502_v51 = vld [vmem:[%s2145_s6 + $0x4] ss:$0 sm:$0xff] }
 0x109   :  { %v1476_v57 = vpack.c.bf16 %v970_v56, %v969_v55 }
 0x10b   :  { %1435 = vmatpush1.bf16.msra.mxu1 %v1434_v59  ;;  %v974_v59 = vld [vmem:[%s2142_s3 + $0x188] sm:$0xff] }
 0x10c   :  { %1437 = vmatprep.subr.bf16.mxu1 %v1436_v62  ;;  %v1480_v61 = vpack.c.bf16 %v974_v59, %v973_v58  ;;  %v976_v62 = vld [vmem:[%s2142_s3 + $0x198] sm:$0xff] }
 0x10d   :  { %v1484_v63 = vpack.c.bf16 %v976_v62, %v975_v60 }
 0x10f   :  { %1439 = vmatpush1.bf16.msra.mxu1 %v1438_v1  ;;  %v387_v1 = vshrl.u32 %v386_v0, 7 }
 0x110   :  { %1441 = vmatprep.subr.bf16.mxu1 %v1440_v4 }
 0x111   :  { %v388_v2 = vsub.s32 0, %v387_v1  ;;  %v392_v4 = vsub.s32 1, %v387_v1 }
 0x113   :  { %1443 = vmatpush1.bf16.msra.mxu1 %v1442_v7  ;;  %v389_v5 = vrot.slane %v954_v3, %v388_v2  ;;  %v393_v6 = vrot.slane %v954_v3, %v392_v4 }
 0x114   :  { %1445 = vmatprep.subr.bf16.mxu1 %v1444_v10 }
 0x117   :  { %1447 = vmatpush1.bf16.msra.mxu1 %v1446_v13 }
 0x118   :  { %1481 = vmatprep.subr.bf16.mxu1 %v1480_v61 }
 0x1cd   :  { %v1168_v24 = vpop.f32.mrb[0].mxu1 }
 0x1ce   :  { %v223_v25 = vadd.f32 %v1168_v24, %v150_v23  ;;  %v217_v26 = vpop.f32.mrb[1].mxu1 }
 0x1cf   :  { %v218_v27 = vadd.f32 %v217_v26, %v150_v23 }
 0x1d0   :  { %v229_v28 = vmin.f32 %v223_v25, 0.0  ;;  %vm227_vm3 = vcmp.gt.f32.partialorder %v223_v25, 0.0 }
 0x1d1   :  { %v228_v29 = vmin.f32 %v218_v27, 0.0  ;;  %vm226_vm4 = vcmp.gt.f32.partialorder %v218_v27, 0.0 }
 0x1d2   :  { %v232_v30 = vmul.f32 1.442695, %v229_v28 }
 0x1d3   :  { %v230_v31 = vmul.f32 1.442695, %v228_v29 }
 0x1d4   :  { %1584 = vpow2.f32 %v232_v30 }
 0x1d5   :  { %1586 = vpow2.f32 %v230_v31 }
 0x1de   :  { %v1585_v32 = vpop.eup %1584 }
 0x1df   :  { %v1587_v33 = vpop.eup %1586  ;;  %v935_v34 = vadd.f32 -1.0, %v1585_v32 }
 0x1e0   :  { %v934_v35 = vadd.f32 -1.0, %v1587_v33 }
 0x1e1   :  { %v237_v36 = vmul.f32 1.6732632, %v935_v34 }
 0x1e2   :  { %v236_v37 = vmul.f32 1.6732632, %v934_v35 }
 0x1e3   :  { %v239_v38 = vsel %vm227_vm3, %v223_v25, %v237_v36 }
 0x1e4   :  { %v238_v39 = vsel %vm226_vm4, %v218_v27, %v236_v37  ;;  %v241_v41 = vmul.f32 1.050701, %v239_v38 }
 0x1e5   :  { %v240_v40 = vmul.f32 1.050701, %v238_v39 }
 0x1e7   :  { %1201 = vmatprep.mubr.f32.mxu0 %v240_v40  ;;  %v959_v40 = vld [vmem:[%s2142_s3 + $0x120] sm:$0xff] }
 0x1e8   :  { %1202 = vmatmul.mubr.f32.vlgmr.msra.gmra.mrb[2].mxu0 %v241_v41  ;;  %v960_v41 = vld [vmem:[%s2142_s3 + $0x128] sm:$0xff] }
 0x1e9   :  { %1451 = vmatpush3.bf16.msra.mxu0 %v1448_v18  ;;  %v1456_v42 = vpack.c.bf16 %v960_v41, %v959_v40  ;;  %v986_v40 = vld [vmem:[%s2142_s3 + $0x1e8] sm:$0xff] }
 0x1ea   :  { %1453 = vmatprep.subr.bf16.mxu0 %v1452_v20 }
 0x1ed   :  { %1455 = vmatpush3.bf16.msra.mxu0 %v1452_v20 }
 0x1ee   :  { %1457 = vmatprep.subr.bf16.mxu0 %v1456_v42 }
 0x1f1   :  { %1459 = vmatpush3.bf16.msra.mxu0 %v1456_v42  ;;  %v987_v42 = vld [vmem:[%s2142_s3 + $0x1f0] sm:$0xff] }
 0x1f2   :  { %1461 = vmatprep.subr.bf16.mxu0 %v1460_v45  ;;  %v1508_v44 = vpack.c.bf16 %v988_v43, %v987_v42 }
 0x1f5   :  { %1463 = vmatpush3.bf16.msra.mxu0 %v1460_v45  ;;  %v991_v45 = vld [vmem:[%s2142_s3 + $0x200] sm:$0xff] }
 0x1f6   :  { %1465 = vmatprep.subr.bf16.mxu0 %v1464_v48 }
 0x1f9   :  { %1467 = vmatpush3.bf16.msra.mxu0 %v1464_v48  ;;  %v1512_v48 = vpack.c.bf16 %v992_v46, %v991_v45 }
 0x1fa   :  { %1469 = vmatprep.subr.bf16.mxu0 %v1468_v52 }
 0x1fd   :  { %1471 = vmatpush3.bf16.msra.mxu0 %v1468_v52 }
 0x1fe   :  { %1473 = vmatprep.subr.bf16.mxu0 %v1472_v54 }
 0x201   :  { %1475 = vmatpush3.bf16.msra.mxu0 %v1472_v54 }
 0x202   :  { %1477 = vmatprep.subr.bf16.mxu0 %v1476_v57 }
 0x205   :  { %1479 = vmatpush3.bf16.msra.mxu0 %v1476_v57 }
 0x206   :  { %1513 = vmatprep.subr.bf16.mxu0 %v1512_v48 }
 0x2bb   :  { %v1203_v22 = vpop.f32.mrb[2].mxu0 }
 0x2bc   :  { %v332_v23 = vadd.f32 %v1203_v22, %v259_v21  ;;  %v326_v24 = vpop.f32.mrb[3].mxu0  ;;  %v474_v22 = vld [vmem:[%s2140_s1 + $0x8] sm:$0xff] }
 0x2bd   :  { %v327_v25 = vadd.f32 %v326_v24, %v259_v21 }
 0x2be   :  { %v338_v26 = vmin.f32 %v332_v23, 0.0  ;;  %vm336_vm6 = vcmp.gt.f32.partialorder %v332_v23, 0.0 }
 0x2bf   :  { %v337_v27 = vmin.f32 %v327_v25, 0.0  ;;  %vm335_vm5 = vcmp.gt.f32.partialorder %v327_v25, 0.0 }
 0x2c0   :  { %v341_v28 = vmul.f32 1.442695, %v338_v26 }
 0x2c1   :  { %v339_v29 = vmul.f32 1.442695, %v337_v27  ;;  %v977_v27 = vld [vmem:[%s2142_s3 + $0x1a0] sm:$0xff] }
 0x2c2   :  { %1588 = vpow2.f32 %v341_v28  ;;  %v978_v28 = vld [vmem:[%s2142_s3 + $0x1a8] sm:$0xff] }
 0x2c3   :  { %1590 = vpow2.f32 %v339_v29  ;;  %v1488_v29 = vpack.c.bf16 %v978_v28, %v977_v27  ;;  %v815_v28 = vld [vmem:[%s2144_s5 + $0x18] sm:$0xff] }
 0x2cc   :  { %v1589_v30 = vpop.eup %1588 }
 0x2cd   :  { %v1591_v31 = vpop.eup %1590  ;;  %v953_v32 = vadd.f32 -1.0, %v1589_v30  ;;  %v979_v30 = vld [vmem:[%s2142_s3 + $0x1b0] sm:$0xff] }
 0x2ce   :  { %v952_v33 = vadd.f32 -1.0, %v1591_v31  ;;  %v980_v31 = vld [vmem:[%s2142_s3 + $0x1b8] sm:$0xff] }
 0x2cf   :  { %v346_v35 = vmul.f32 1.6732632, %v953_v32  ;;  %v1492_v32 = vpack.c.bf16 %v980_v31, %v979_v30  ;;  %v611_v30 = vld [vmem:[%s2145_s6 + $0x5] ss:$0 sm:$0xff] }
 0x2d0   :  { %v345_v34 = vmul.f32 1.6732632, %v952_v33  ;;  %v981_v33 = vld [vmem:[%s2142_s3 + $0x1c0] sm:$0xff] }
 0x2d1   :  { %v348_v38 = vsel %vm336_vm6, %v332_v23, %v346_v35 }
 0x2d2   :  { %v347_v36 = vsel %vm335_vm5, %v327_v25, %v345_v34  ;;  %v350_v39 = vmul.f32 1.050701, %v348_v38  ;;  %v982_v34 = vld [vmem:[%s2142_s3 + $0x1c8] sm:$0xff] }
 0x2d3   :  { %v349_v37 = vmul.f32 1.050701, %v347_v36  ;;  %v1496_v35 = vpack.c.bf16 %v982_v34, %v981_v33  ;;  %v983_v36 = vld [vmem:[%s2142_s3 + $0x1d0] sm:$0xff] }
 0x2d5   :  { %461 = vmatmul.mubr.f32.vlgmr.msra.gmra.mrb[2].mxu1 %v349_v37  ;;  %v984_v37 = vld [vmem:[%s2142_s3 + $0x1d8] sm:$0xff] }
 0x2d6   :  { %466 = vmatprep.mubr.f32.mxu1 %v1632_v14  ;;  %1483 = vmatpush3.bf16.msra.mxu1 %v1480_v61  ;;  %v1500_v38 = vpack.c.bf16 %v984_v37, %v983_v36 }
 0x2d7   :  { %1485 = vmatprep.subr.bf16.mxu1 %v1484_v63 }
 0x2d9   :  { %467 = vmatmul.mubr.f32.gmra.mrb[4].mxu1 %v350_v39  ;;  %v985_v39 = vld [vmem:[%s2142_s3 + $0x1e0] sm:$0xff] }
 0x2da   :  { %1487 = vmatpush3.bf16.msra.mxu1 %v1484_v63  ;;  %v1504_v41 = vpack.c.bf16 %v986_v40, %v985_v39 }
 0x2db   :  { %1489 = vmatprep.subr.bf16.mxu1 %v1488_v29 }
 0x2de   :  { %1491 = vmatpush3.bf16.msra.mxu1 %v1488_v29 }
 0x2df   :  { %1493 = vmatprep.subr.bf16.mxu1 %v1492_v32 }
 0x2e2   :  { %1495 = vmatpush3.bf16.msra.mxu1 %v1492_v32 }
 0x2e3   :  { %1497 = vmatprep.subr.bf16.mxu1 %v1496_v35 }
 0x2e6   :  { %1499 = vmatpush3.bf16.msra.mxu1 %v1496_v35 }
 0x2e7   :  { %1501 = vmatprep.subr.bf16.mxu1 %v1500_v38 }
 0x2ea   :  { %1503 = vmatpush3.bf16.msra.mxu1 %v1500_v38 }
 0x2eb   :  { %1505 = vmatprep.subr.bf16.mxu1 %v1504_v41 }
 0x2ee   :  { %1507 = vmatpush3.bf16.msra.mxu1 %v1504_v41 }
 0x2ef   :  { %1509 = vmatprep.subr.bf16.mxu1 %v1508_v44 }
 0x2f2   :  { %1511 = vmatpush3.bf16.msra.mxu1 %v1508_v44 }
 0x3a8   :  { %v462_v7 = vpop.f32.mrb[2].mxu1 }
 0x3a9   :  { %v463_v8 = vadd.f32 %v462_v7, %v389_v5  ;;  %v464_v9 = vpop.f32.mrb[3].mxu1  ;;  %v996_v7 = vld [vmem:[%s2142_s3 + $0x228] sm:$0xff] }
 0x3aa   :  { %v465_v10 = vadd.f32 %v464_v9, %v393_v6  ;;  %v997_v9 = vld [vmem:[%s2142_s3 + $0x230] sm:$0xff] }
 0x3ab   :  { %906 = vst [vmem:[%s2147_s8] sm:$0xff] %v463_v8 }
 0x3ac   :  { %v475_v11 = vmul.f32 0.5, %v465_v10  ;;  %907 = vst [vmem:[%s2147_s8 + $0x8] sm:$0xff] %v465_v10  ;;  %v468_v12 = vpop.f32.mrb[4].mxu1  ;;  %v998_v10 = vld [vmem:[%s2142_s3 + $0x238] sm:$0xff] }
 0x3ad   :  { %v469_v13 = vadd.f32 %v468_v12, %v389_v5  ;;  %v470_v14 = vpop.f32.mrb[5].mxu1  ;;  %v999_v12 = vld [vmem:[%s2142_s3 + $0x240] sm:$0xff] }
 0x3ae   :  { %v477_v15 = vmul.f32 1.442695, %v475_v11  ;;  %v471_v16 = vadd.f32 %v470_v14, %v393_v6  ;;  %v995_v6 = vld [vmem:[%s2142_s3 + $0x220] sm:$0xff]  ;;  %v1524_v11 = vpack.c.bf16 %v998_v10, %v997_v9 }
 0x3af   :  { %908 = vst [vmem:[%s2147_s8 + $0x10] sm:$0xff] %v469_v13 }
 0x3b0   :  { %1592 = vpow2.f32 %v477_v15  ;;  %v476_v17 = vmul.f32 0.5, %v471_v16  ;;  %909 = vst [vmem:[%s2147_s8 + $0x18] sm:$0xff] %v471_v16  ;;  %v1001_v15 = vld [vmem:[%s2142_s3 + $0x250] sm:$0xff]  ;;  %v1002_v16 = vld [vmem:[%s2142_s3 + $0x258] sm:$0xff] }
 0x3b2   :  { %v479_v18 = vmul.f32 1.442695, %v476_v17  ;;  %v1532_v17 = vpack.c.bf16 %v1002_v16, %v1001_v15 }
 0x3b4   :  { %1594 = vpow2.f32 %v479_v18  ;;  %v1003_v18 = vld [vmem:[%s2142_s3 + $0x260] sm:$0xff] }
 0x3ba   :  { %v1593_v20 = vpop.eup %1592 }
 0x3bb   :  { %v481_v21 = vmul.f32 %v1593_v20, %v473_v19  ;;  %v1004_v19 = vld [vmem:[%s2142_s3 + $0x268] sm:$0xff] }
 0x3bc   :  { %v1536_v20 = vpack.c.bf16 %v1004_v19, %v1003_v18 }
 0x3bd   :  { %v483_v23 = vadd.f32 %v481_v21, %v463_v8  ;;  %v1520_v8 = vpack.c.bf16 %v996_v7, %v995_v6  ;;  %v1005_v21 = vld [vmem:[%s2142_s3 + $0x270] sm:$0xff] }
 0x3be   :  { %v1595_v24 = vpop.eup %1594 }
 0x3bf   :  { %1236 = vmatprep.mubr.f32.mxu0 %v483_v23  ;;  %v482_v25 = vmul.f32 %v1595_v24, %v474_v22  ;;  %v1006_v22 = vld [vmem:[%s2142_s3 + $0x278] sm:$0xff]  ;;  %v812_v24 = vld [vmem:[%s2144_s5] sm:$0xff] }
 0x3c0   :  { %v1540_v23 = vpack.c.bf16 %v1006_v22, %v1005_v21  ;;  %v828_v22 = vld [vmem:[%s2145_s6 + $0x7] ss:$0 sm:$0xff] }
 0x3c1   :  { %v484_v26 = vadd.f32 %v482_v25, %v469_v13  ;;  %v1000_v13 = vld [vmem:[%s2142_s3 + $0x248] sm:$0xff] }
 0x3c2   :  { %v1528_v14 = vpack.c.bf16 %v1000_v13, %v999_v12  ;;  %v813_v25 = vld [vmem:[%s2144_s5 + $0x8] sm:$0xff] }
 0x3c3   :  { %1237 = vmatmul.mubr.f32.vlgmr.msra.gmra.mrb[4].mxu0 %v484_v26  ;;  %v814_v26 = vld [vmem:[%s2144_s5 + $0x10] sm:$0xff]  ;;  %v1544_v27 = vpack.c.bf16 %v813_v25, %v812_v24 }
 0x3c4   :  { %1515 = vmatpush3.bf16.msra.mxu0 %v1512_v48  ;;  %v1548_v29 = vpack.c.bf16 %v815_v28, %v814_v26 }
 0x3c5   :  { %1517 = vmatprep.subr.bf16.mxu0 %v1516_v50  ;;  %1545 = vmatprep.subr.bf16.mxu1 %v1544_v27 }
 0x3c8   :  { %1519 = vmatpush3.bf16.msra.mxu0 %v1516_v50  ;;  %v817_v50 = vld [vmem:[%s2144_s5 + $0x28] sm:$0xff] }
 0x3c9   :  { %1521 = vmatprep.subr.bf16.mxu0 %v1520_v8 }
 0x3cc   :  { %1523 = vmatpush3.bf16.msra.mxu0 %v1520_v8 }
 0x3cd   :  { %1525 = vmatprep.subr.bf16.mxu0 %v1524_v11 }
 0x3d0   :  { %1527 = vmatpush3.bf16.msra.mxu0 %v1524_v11 }
 0x3d1   :  { %1529 = vmatprep.subr.bf16.mxu0 %v1528_v14 }
 0x3d4   :  { %1531 = vmatpush3.bf16.msra.mxu0 %v1528_v14 }
 0x3d5   :  { %1533 = vmatprep.subr.bf16.mxu0 %v1532_v17 }
 0x3d8   :  { %1535 = vmatpush3.bf16.msra.mxu0 %v1532_v17 }
 0x3d9   :  { %1537 = vmatprep.subr.bf16.mxu0 %v1536_v20 }
 0x3dc   :  { %1539 = vmatpush3.bf16.msra.mxu0 %v1536_v20 }
 0x3dd   :  { %1541 = vmatprep.subr.bf16.mxu0 %v1540_v23 }
 0x3e0   :  { %1543 = vmatpush3.bf16.msra.mxu0 %v1540_v23 }
 0x496   :  { %v1238_v52 = vpop.f32.mrb[4].mxu0 }
 0x497   :  { %v575_v53 = vadd.f32 %v1238_v52, %v502_v51  ;;  %v569_v54 = vpop.f32.mrb[5].mxu0  ;;  %v818_v52 = vld [vmem:[%s2144_s5 + $0x30] sm:$0xff] }
 0x498   :  { %v570_v55 = vadd.f32 %v569_v54, %v502_v51  ;;  %v1552_v51 = vpack.c.bf16 %v817_v50, %v816_v49 }
 0x499   :  { %v581_v56 = vmin.f32 %v575_v53, 0.0  ;;  %vm579_vm7 = vcmp.gt.f32.partialorder %v575_v53, 0.0 }
 0x49a   :  { %v580_v57 = vmin.f32 %v570_v55, 0.0  ;;  %vm578_vm8 = vcmp.gt.f32.partialorder %v570_v55, 0.0 }
 0x49b   :  { %v584_v58 = vmul.f32 1.442695, %v581_v56  ;;  %v821_v56 = vld [vmem:[%s2144_s5 + $0x48] sm:$0xff] }
 0x49c   :  { %v582_v59 = vmul.f32 1.442695, %v580_v57 }
 0x49d   :  { %1596 = vpow2.f32 %v584_v58  ;;  %v822_v58 = vld [vmem:[%s2144_s5 + $0x50] sm:$0xff] }
 0x49e   :  { %1598 = vpow2.f32 %v582_v59  ;;  %v823_v59 = vld [vmem:[%s2144_s5 + $0x58] sm:$0xff] }
 0x4a7   :  { %v1597_v60 = vpop.eup %1596 }
 0x4a8   :  { %v1599_v61 = vpop.eup %1598  ;;  %v972_v62 = vadd.f32 -1.0, %v1597_v60  ;;  %v1564_v60 = vpack.c.bf16 %v823_v59, %v822_v58 }
 0x4a9   :  { %v971_v63 = vadd.f32 -1.0, %v1599_v61  ;;  %v824_v61 = vld [vmem:[%s2144_s5 + $0x60] sm:$0xff] }
 0x4aa   :  { %v589_v0 = vmul.f32 1.6732632, %v972_v62  ;;  %v825_v62 = vld [vmem:[%s2144_s5 + $0x68] sm:$0xff] }
 0x4ab   :  { %v588_v1 = vmul.f32 1.6732632, %v971_v63  ;;  %v1568_v63 = vpack.c.bf16 %v825_v62, %v824_v61 }
 0x4ac   :  { %v591_v2 = vsel %vm579_vm7, %v575_v53, %v589_v0  ;;  %v819_v53 = vld [vmem:[%s2144_s5 + $0x38] sm:$0xff]  ;;  %v826_v0 = vld [vmem:[%s2144_s5 + $0x70] sm:$0xff] }
 0x4ad   :  { %v590_v3 = vsel %vm578_vm8, %v570_v55, %v588_v1  ;;  %v593_v5 = vmul.f32 1.050701, %v591_v2  ;;  %v1556_v54 = vpack.c.bf16 %v819_v53, %v818_v52  ;;  %v820_v55 = vld [vmem:[%s2144_s5 + $0x40] sm:$0xff]  ;;  %v827_v1 = vld [vmem:[%s2144_s5 + $0x78] sm:$0xff] }
 0x4ae   :  { %v592_v4 = vmul.f32 1.050701, %v590_v3  ;;  %v1560_v57 = vpack.c.bf16 %v821_v56, %v820_v55  ;;  %v1572_v2 = vpack.c.bf16 %v827_v1, %v826_v0  ;;  %v720_v3 = vld [vmem:[%s2145_s6 + $0x6] ss:$0 sm:$0xff] }
 0x4b0   :  { %1271 = vmatprep.mubr.f32.mxu1 %v592_v4 }
 0x4b1   :  { %1272 = vmatmul.mubr.f32.vlgmr.msra.gmra.mrb[6].mxu1 %v593_v5 }
 0x4b2   :  { %1547 = vmatpush3.bf16.msra.mxu1 %v1544_v27 }
 0x4b3   :  { %1549 = vmatprep.subr.bf16.mxu1 %v1548_v29 }
 0x4b6   :  { %1551 = vmatpush3.bf16.msra.mxu1 %v1548_v29 }
 0x4b7   :  { %1553 = vmatprep.subr.bf16.mxu1 %v1552_v51 }
 0x4ba   :  { %1555 = vmatpush3.bf16.msra.mxu1 %v1552_v51 }
 0x4bb   :  { %1557 = vmatprep.subr.bf16.mxu1 %v1556_v54 }
 0x4be   :  { %1559 = vmatpush3.bf16.msra.mxu1 %v1556_v54 }
 0x4bf   :  { %1561 = vmatprep.subr.bf16.mxu1 %v1560_v57 }
 0x4c2   :  { %1563 = vmatpush3.bf16.msra.mxu1 %v1560_v57 }
 0x4c3   :  { %1565 = vmatprep.subr.bf16.mxu1 %v1564_v60 }
 0x4c6   :  { %1567 = vmatpush3.bf16.msra.mxu1 %v1564_v60 }
 0x4c7   :  { %1569 = vmatprep.subr.bf16.mxu1 %v1568_v63 }
 0x4ca   :  { %1571 = vmatpush3.bf16.msra.mxu1 %v1568_v63 }
 0x4cb   :  { %1573 = vmatprep.subr.bf16.mxu1 %v1572_v2 }
 0x4ce   :  { %1575 = vmatpush3.bf16.msra.mxu1 %v1572_v2 }
 0x584   :  { %v1273_v31 = vpop.f32.mrb[6].mxu1 }
 0x585   :  { %v684_v32 = vadd.f32 %v1273_v31, %v611_v30  ;;  %v678_v33 = vpop.f32.mrb[7].mxu1 }
 0x586   :  { %v679_v34 = vadd.f32 %v678_v33, %v611_v30 }
 0x587   :  { %v690_v35 = vmin.f32 %v684_v32, 0.0  ;;  %vm688_vm9 = vcmp.gt.f32.partialorder %v684_v32, 0.0 }
 0x588   :  { %v689_v36 = vmin.f32 %v679_v34, 0.0  ;;  %vm687_vm10 = vcmp.gt.f32.partialorder %v679_v34, 0.0 }
 0x589   :  { %v693_v37 = vmul.f32 1.442695, %v690_v35 }
 0x58a   :  { %v691_v38 = vmul.f32 1.442695, %v689_v36 }
 0x58b   :  { %1600 = vpow2.f32 %v693_v37 }
 0x58c   :  { %1602 = vpow2.f32 %v691_v38 }
 0x595   :  { %v1601_v39 = vpop.eup %1600 }
 0x596   :  { %v1603_v40 = vpop.eup %1602  ;;  %v990_v41 = vadd.f32 -1.0, %v1601_v39 }
 0x597   :  { %v989_v42 = vadd.f32 -1.0, %v1603_v40 }
 0x598   :  { %v698_v43 = vmul.f32 1.6732632, %v990_v41 }
 0x599   :  { %v697_v44 = vmul.f32 1.6732632, %v989_v42 }
 0x59a   :  { %v700_v45 = vsel %vm688_vm9, %v684_v32, %v698_v43 }
 0x59b   :  { %v699_v46 = vsel %vm687_vm10, %v679_v34, %v697_v44  ;;  %v702_v48 = vmul.f32 1.050701, %v700_v45 }
 0x59c   :  { %v701_v47 = vmul.f32 1.050701, %v699_v46 }
 0x59e   :  { %1306 = vmatprep.mubr.f32.mxu0 %v701_v47 }
 0x59f   :  { %1307 = vmatmul.mubr.f32.vlgmr.msra.gmra.mrb[6].mxu0 %v702_v48 }
 0x672   :  { %v1308_v4 = vpop.f32.mrb[6].mxu0 }
 0x673   :  { %v793_v5 = vadd.f32 %v1308_v4, %v720_v3  ;;  %v787_v6 = vpop.f32.mrb[7].mxu0 }
 0x674   :  { %v788_v7 = vadd.f32 %v787_v6, %v720_v3 }
 0x675   :  { %v799_v8 = vmin.f32 %v793_v5, 0.0  ;;  %vm797_vm11 = vcmp.gt.f32.partialorder %v793_v5, 0.0 }
 0x676   :  { %v798_v9 = vmin.f32 %v788_v7, 0.0  ;;  %vm796_vm12 = vcmp.gt.f32.partialorder %v788_v7, 0.0 }
 0x677   :  { %v802_v10 = vmul.f32 1.442695, %v799_v8 }
 0x678   :  { %v800_v11 = vmul.f32 1.442695, %v798_v9 }
 0x679   :  { %1604 = vpow2.f32 %v802_v10 }
 0x67a   :  { %1606 = vpow2.f32 %v800_v11 }
 0x683   :  { %v1605_v12 = vpop.eup %1604 }
 0x684   :  { %v1607_v13 = vpop.eup %1606  ;;  %v1008_v14 = vadd.f32 -1.0, %v1605_v12 }
 0x685   :  { %v1007_v15 = vadd.f32 -1.0, %v1607_v13 }
 0x686   :  { %v807_v16 = vmul.f32 1.6732632, %v1008_v14 }
 0x687   :  { %v806_v17 = vmul.f32 1.6732632, %v1007_v15 }
 0x688   :  { %v809_v18 = vsel %vm797_vm11, %v793_v5, %v807_v16 }
 0x689   :  { %v808_v19 = vsel %vm796_vm12, %v788_v7, %v806_v17  ;;  %v811_v21 = vmul.f32 1.050701, %v809_v18 }
 0x68a   :  { %v810_v20 = vmul.f32 1.050701, %v808_v19 }
 0x68c   :  { %1341 = vmatprep.mubr.f32.mxu1 %v810_v20 }
 0x68d   :  { %1342 = vmatmul.mubr.f32.vlgmr.msra.gmra.mrb[8].mxu1 %v811_v21 }
 0x760   :  { %v1343_v23 = vpop.f32.mrb[8].mxu1 }
 0x761   :  { %v901_v24 = vadd.f32 %v1343_v23, %v828_v22  ;;  %v895_v25 = vpop.f32.mrb[9].mxu1 }
 0x762   :  { %v896_v26 = vadd.f32 %v895_v25, %v828_v22 }
 0x763   :  { %905 = vst [vmem:[#allocation2 + $0x8] sm:$0xff] %v901_v24 }
 0x764   :  { %904 = vst [vmem:[#allocation2] sm:$0xff] %v896_v26 }
 0x765   :  { %1619 = shalt.err (!%p1616_p4)
}
 0x766   :  { %s1620_s6 = scalar_lea.hbm %s2146_s7, 256 }
 0x767   :  { %p1621_p5 = scmp.ne.s32.totalorder %s2146_s7, %s1620_s6  ;;  %p1624_p6 = scmp.lt.u32.totalorder %s1620_s6, %s2146_s7 }
 0x769   :  { %p1626_p7 = pnand %p1624_p6, %p1621_p5 }
 0x76b   :  { %1629 = shalt.err (!%p1626_p7)
}
 0x76c   :  { %s1634_s28 = smov 128   ;;  %s1635_s29 = smov 8  }
 0x76d   :  { %921 = dma.vmem_to_hbm [thread:$0]  %s916_s2, 256, %s2146_s7, [#allocation3], %s1634_s28, %s1634_s28, %s1635_s29  }
 0x76e   :  { %1630 = dma.done.wait [#allocation3], 256  }
 0x76f   :  { %1631 = vsyncadd [#allocation3], 4294967040 }
 0x770   :  { %929 = vsyncpa [#allocation3], 1 }

</bundles_post_ra>
